<compile_context>
chip_gen: v7x
topology: tpu7x:2x2x1
jax: 0.10.0
libtpu: 0.0.40
codegen_flags: <defaults>
</compile_context>

<pallas_src>
import functools

import jax
import jax.numpy as jnp
from jax.experimental import pallas as pl
from jax.experimental.pallas import tpu as pltpu


LANE = 128
SUBLANE = 8
MAX_CHUNK = 8  # timesteps per grid iteration (amortizes per-step grid overhead)


def _round_up(n, m):
    return ((n + m - 1) // m) * m


def _pick_chunk(T, cap=MAX_CHUNK):
    for ts in range(min(T, cap), 0, -1):
        if T % ts == 0:
            return ts
    return 1


# -----------------------------------------------------------------------------
# Kernel: TS LSTM steps per grid iteration (grid = (T // TS,)).
# h carry lives in the h-slot of the fused [x | h] scratch, c in its own
# scratch; weights resident in VMEM across the whole sequence.
# -----------------------------------------------------------------------------
def lstm_seq_kernel(x_ref, h0_ref, c0_ref, w_ref, b_ref, wp_ref,
                    out_ref, h_out_ref, c_out_ref, xh_scr, c_scr):
    TS = x_ref.shape[0]
    Bp = x_ref.shape[1]
    Ip = x_ref.shape[-1]
    Hp = h0_ref.shape[-1]
    chunk = pl.program_id(0)

    # Initialize the carries (persistent VMEM scratch) from the initial state.
    @pl.when(chunk == 0)
    def _():
        xh_scr[:, Ip:] = h0_ref[...]
        c_scr[...] = c0_ref[...]

    # Hoist the bias broadcast out of the per-step loop (not CSE'd otherwise).
    bias = jnp.broadcast_to(b_ref[...], (Bp, 4 * Hp))

    # Static unroll over the chunk: all x/out slices are static & lane-dense.
    for s in range(TS):
        # Fused [x | h] operand; Ip and Hp are 128-multiples -> aligned stores.
        xh_scr[:, :Ip] = x_ref[s]

        # Single fused MXU pass for all four gates: (Bp, Ip+Hp) @ (Ip+Hp, 4*Hp).
        g = jnp.dot(xh_scr[...], w_ref[...],
                    preferred_element_type=jnp.float32) + bias

        # Gate order: i, f, o, z.  Each slice is a lane-aligned 128-multiple.
        i_gate = jax.nn.sigmoid(g[:, 0 * Hp:1 * Hp])
        f_gate = jax.nn.sigmoid(g[:, 1 * Hp:2 * Hp])
        o_gate = jax.nn.sigmoid(g[:, 2 * Hp:3 * Hp])
        z_gate = jnp.tanh(g[:, 3 * Hp:4 * Hp])

        c_new = f_gate * c_scr[...] + i_gate * z_gate
        h_new = jnp.tanh(c_new) * o_gate

        # Output projection on the MXU (lane-dense padded output).
        out_ref[s] = jnp.dot(h_new, wp_ref[...],
                             preferred_element_type=jnp.float32).astype(out_ref.dtype)

        # Write the carries back into the persistent scratch.
        xh_scr[:, Ip:] = h_new
        c_scr[...] = c_new

    # Emit the final state once, at the last chunk.
    @pl.when(chunk == pl.num_programs(0) - 1)
    def _():
        h_out_ref[...] = xh_scr[:, Ip:]
        c_out_ref[...] = c_scr[...]


# -----------------------------------------------------------------------------
# Parameter packing: pad each gate block to the lane-padded width and stack
# W = [Wx ; Wh] so the kernel does a single dot against [x | h].
# -----------------------------------------------------------------------------
def pack_params(params, input_size, hidden_size, out_size):
    wx, bx, wh, wp = params
    I, H, O = input_size, hidden_size, out_size
    Ip, Hp, Op = _round_up(I, LANE), _round_up(H, LANE), _round_up(O, LANE)

    def pad_gate_cols(w, rows, rows_p):
        # w: (rows, 4H) -> (rows_p, 4*Hp), gate-wise column padding.
        gates = [w[:, k * H:(k + 1) * H] for k in range(4)]
        gates = [jnp.pad(gk, ((0, rows_p - rows), (0, Hp - H))) for gk in gates]
        return jnp.concatenate(gates, axis=1)

    wx_p = pad_gate_cols(wx, I, Ip)                    # (Ip, 4*Hp)
    wh_p = pad_gate_cols(wh, H, Hp)                    # (Hp, 4*Hp)
    w_packed = jnp.concatenate([wx_p, wh_p], axis=0)   # (Ip+Hp, 4*Hp)

    b_gates = [bx[:, k * H:(k + 1) * H] for k in range(4)]
    b_packed = jnp.concatenate(
        [jnp.pad(bk, ((0, 0), (0, Hp - H))) for bk in b_gates], axis=1)  # (1, 4*Hp)

    wp_packed = jnp.pad(wp, ((0, Hp - H), (0, Op - O)))  # (Hp, Op)
    return w_packed, b_packed, wp_packed


# -----------------------------------------------------------------------------
# Wrappers
# -----------------------------------------------------------------------------
@functools.partial(jax.jit, static_argnames=("input_size", "hidden_size", "out_size"))
def _lstm_sequence_impl(x_seq, hidden, cell, params, *, input_size, hidden_size,
                        out_size):
    T, B, I = x_seq.shape
    H, O = hidden_size, out_size
    Bp = _round_up(B, SUBLANE)
    Ip, Hp, Op = _round_up(I, LANE), _round_up(H, LANE), _round_up(O, LANE)
    TS = _pick_chunk(T)
    num_chunks = T // TS

    w_packed, b_packed, wp_packed = pack_params(params, I, H, O)

    x_p = jnp.pad(x_seq.astype(jnp.float32), ((0, 0), (0, Bp - B), (0, Ip - I)))
    h_p = jnp.pad(hidden.astype(jnp.float32), ((0, Bp - B), (0, Hp - H)))
    c_p = jnp.pad(cell.astype(jnp.float32), ((0, Bp - B), (0, Hp - H)))

    flops = int(2 * T * Bp * (Ip + Hp) * 4 * Hp + 2 * T * Bp * Hp * Op)
    transcendentals = int(5 * T * Bp * Hp)
    bytes_accessed = int(4 * (x_p.size + w_packed.size + b_packed.size +
                              wp_packed.size + 4 * Bp * Hp + T * Bp * Op))

    out_p, h_out_p, c_out_p = pl.pallas_call(
        lstm_seq_kernel,
        out_shape=(
            jax.ShapeDtypeStruct((T, Bp, Op), jnp.float32),
            jax.ShapeDtypeStruct((Bp, Hp), jnp.float32),
            jax.ShapeDtypeStruct((Bp, Hp), jnp.float32),
        ),
        grid_spec=pltpu.PrefetchScalarGridSpec(
            num_scalar_prefetch=0,
            grid=(num_chunks,),
            in_specs=[
                pl.BlockSpec((TS, Bp, Ip), lambda c: (c, 0, 0)),    # x chunk (streamed)
                pl.BlockSpec((Bp, Hp), lambda c: (0, 0)),           # h0 (resident)
                pl.BlockSpec((Bp, Hp), lambda c: (0, 0)),           # c0 (resident)
                pl.BlockSpec((Ip + Hp, 4 * Hp), lambda c: (0, 0)),  # W  (resident)
                pl.BlockSpec((1, 4 * Hp), lambda c: (0, 0)),        # b  (resident)
                pl.BlockSpec((Hp, Op), lambda c: (0, 0)),           # Wp (resident)
            ],
            out_specs=(
                pl.BlockSpec((TS, Bp, Op), lambda c: (c, 0, 0)),    # out chunk
                pl.BlockSpec((Bp, Hp), lambda c: (0, 0)),           # final h
                pl.BlockSpec((Bp, Hp), lambda c: (0, 0)),           # final c
            ),
            scratch_shapes=[
                pltpu.VMEM((Bp, Ip + Hp), jnp.float32),   # fused [x | h] + h carry
                pltpu.VMEM((Bp, Hp), jnp.float32),        # c carry
            ],
        ),
        compiler_params=pltpu.CompilerParams(
            dimension_semantics=("arbitrary",),  # time carries h/c
        ),
        cost_estimate=pl.CostEstimate(
            flops=flops, transcendentals=transcendentals,
            bytes_accessed=bytes_accessed),
    )(x_p, h_p, c_p, w_packed, b_packed, wp_packed)

    out = out_p[:, :B, :O]
    h_out = h_out_p[:B, :H]
    c_out = c_out_p[:B, :H]
    return out, (h_out, c_out)


def lstm_sequence_forward(x_seq, hc, params):
    """Run T LSTM steps inside one Pallas call. x_seq: (T, B, I)."""
    hidden, cell = hc
    wx, bx, wh, wp = params
    return _lstm_sequence_impl(
        x_seq, hidden, cell, params,
        input_size=x_seq.shape[-1], hidden_size=hidden.shape[-1],
        out_size=wp.shape[-1])


def lstm_forward(x, hc, params):
    """One LSTM cell step (matches the PyTorch module's forward).

    Returns (output, (hidden, cell))."""
    out_seq, hc_new = lstm_sequence_forward(x[None], hc, params)
    return out_seq[0], hc_new


# -----------------------------------------------------------------------------
# Init + pure-JAX reference (mirrors the PyTorch module)
# -----------------------------------------------------------------------------
def init_params(key, input_size, hidden_size, out_size):
    """Logical params: wx (I,4H), bx (1,4H), wh (H,4H), wp (H,O); gate order i,f,o,z."""
    ks = jax.random.split(key, 10)

    def uni(k, shape, fan_in):
        bound = 1.0 / jnp.sqrt(jnp.float32(fan_in))
        return jax.random.uniform(k, shape, jnp.float32, -bound, bound)

    H, I, O = hidden_size, input_size, out_size
    w_ix, w_fx, w_ox, w_zx = (uni(ks[i], (I, H), I) for i in range(4))
    b_ix, b_fx, b_ox, b_zx = (uni(ks[4 + i], (H,), I) for i in range(4))
    w_ih = uni(ks[8], (H, H), H)
    ks2 = jax.random.split(ks[9], 4)
    w_fh = uni(ks2[0], (H, H), H)
    w_oh = uni(ks2[1], (H, H), H)
    w_zh = uni(ks2[2], (H, H), H)
    w_p = uni(ks2[3], (H, O), H)

    wx = jnp.concatenate([w_ix, w_fx, w_ox, w_zx], axis=1)   # (I, 4H)
    bx = jnp.concatenate([b_ix, b_fx, b_ox, b_zx])[None, :]  # (1, 4H)
    wh = jnp.concatenate([w_ih, w_fh, w_oh, w_zh], axis=1)   # (H, 4H)
    return wx, bx, wh, w_p


def reference_forward(x, hc, params):
    hidden, cell = hc
    wx, bx, wh, wp = params
    H = hidden.shape[1]
    g = x @ wx + bx + hidden @ wh
    i = jax.nn.sigmoid(g[:, 0 * H:1 * H])
    f = jax.nn.sigmoid(g[:, 1 * H:2 * H])
    o = jax.nn.sigmoid(g[:, 2 * H:3 * H])
    z = jnp.tanh(g[:, 3 * H:4 * H])
    cell = f * cell + i * z
    hidden = jnp.tanh(cell) * o
    return hidden @ wp, (hidden, cell)


def reference_sequence(x_seq, hc, params):
    def step(carry, x):
        out, carry = reference_forward(x, carry, params)
        return carry, out
    carry, outs = jax.lax.scan(step, hc, x_seq)
    return outs, carry


if __name__ == "__main__":
    input_size, hidden_size, out_size = 16, 32, 8
    batch, seqlen = 2, 8

    key = jax.random.PRNGKey(0)
    k_p, k_x, _, _ = jax.random.split(key, 4)

    params = init_params(k_p, input_size, hidden_size, out_size)
    x_seq = jax.random.normal(k_x, (seqlen, batch, input_size), jnp.float32)
    hidden0 = jnp.zeros((batch, hidden_size), jnp.float32)  # init_hidden analogue
    cell0 = jnp.zeros((batch, hidden_size), jnp.float32)

    # --- single-step (matches the PyTorch module's forward signature) ---
    out1, (h1, c1) = lstm_forward(x_seq[0], (hidden0, cell0), params)
    jax.block_until_ready((out1, h1, c1))
    out1_r, (h1_r, c1_r) = reference_forward(x_seq[0], (hidden0, cell0), params)
    assert jnp.allclose(out1, out1_r, atol=1e-4), "single-step output mismatch"
    assert jnp.allclose(h1, h1_r, atol=1e-4), "single-step hidden mismatch"
    assert jnp.allclose(c1, c1_r, atol=1e-4), "single-step cell mismatch"

    # --- full sequence inside one kernel (chunked time loop, weights resident) ---
    outs, (h_T, c_T) = lstm_sequence_forward(x_seq, (hidden0, cell0), params)
    jax.block_until_ready((outs, h_T, c_T))
    outs_r, (h_T_r, c_T_r) = reference_sequence(x_seq, (hidden0, cell0), params)
    assert jnp.allclose(outs, outs_r, atol=1e-4), "sequence output mismatch"
    assert jnp.allclose(h_T, h_T_r, atol=1e-4), "sequence hidden mismatch"
    assert jnp.allclose(c_T, c_T_r, atol=1e-4), "sequence cell mismatch"

    print("KERNEL_OK")
</pallas_src>

<mosaic_0001>
module attributes {stable_mosaic.version = 11 : i64} {
  func.func @lstm_seq_kernel(%arg0: i32, %arg1: memref<1x8x128xf32, #tpu.memory_space<vmem>>, %arg2: memref<8x128xf32, #tpu.memory_space<vmem>>, %arg3: memref<8x128xf32, #tpu.memory_space<vmem>>, %arg4: memref<256x512xf32, #tpu.memory_space<vmem>>, %arg5: memref<1x512xf32, #tpu.memory_space<vmem>>, %arg6: memref<128x128xf32, #tpu.memory_space<vmem>>, %arg7: memref<1x8x128xf32, #tpu.memory_space<vmem>>, %arg8: memref<8x128xf32, #tpu.memory_space<vmem>>, %arg9: memref<8x128xf32, #tpu.memory_space<vmem>>, %arg10: memref<8x256xf32, #tpu.memory_space<vmem>>, %arg11: memref<8x128xf32, #tpu.memory_space<vmem>>) attributes {dimension_semantics = [#tpu.dimension_semantics<arbitrary>], iteration_bounds = array<i64: 1>, scalar_prefetch = 0 : i64, scratch_operands = 2 : i64, tpu.core_type = #tpu.core_type<tc>, window_params = [{transform_indices = @transform_0, window_bounds = array<i64: 1, 8, 128>}, {pipeline_mode = #tpu.pipeline_mode<synchronous>, transform_indices = @transform_1, window_bounds = array<i64: 8, 128>}, {pipeline_mode = #tpu.pipeline_mode<synchronous>, transform_indices = @transform_2, window_bounds = array<i64: 8, 128>}, {pipeline_mode = #tpu.pipeline_mode<synchronous>, transform_indices = @transform_3, window_bounds = array<i64: 256, 512>}, {pipeline_mode = #tpu.pipeline_mode<synchronous>, transform_indices = @transform_4, window_bounds = array<i64: 1, 512>}, {pipeline_mode = #tpu.pipeline_mode<synchronous>, transform_indices = @transform_5, window_bounds = array<i64: 128, 128>}, {transform_indices = @transform_6, window_bounds = array<i64: 1, 8, 128>}, {pipeline_mode = #tpu.pipeline_mode<synchronous>, transform_indices = @transform_7, window_bounds = array<i64: 8, 128>}, {pipeline_mode = #tpu.pipeline_mode<synchronous>, transform_indices = @transform_8, window_bounds = array<i64: 8, 128>}]} {
    %c0_i32 = arith.constant 0 : i32
    %0 = arith.cmpi eq, %arg0, %c0_i32 : i32
    %1 = arith.extui %0 : i1 to i32
    %c0_i32_0 = arith.constant 0 : i32
    %2 = arith.cmpi ne, %1, %c0_i32_0 : i32
    scf.if %2 {
      %c0_27 = arith.constant 0 : index
      %c0_28 = arith.constant 0 : index
      %49 = vector.load %arg2[%c0_27, %c0_28] : memref<8x128xf32, #tpu.memory_space<vmem>>, vector<8x128xf32>
      %c0_29 = arith.constant 0 : index
      %c128_30 = arith.constant 128 : index
      %50 = vector.load %arg10[%c0_29, %c128_30] : memref<8x256xf32, #tpu.memory_space<vmem>>, vector<8x128xf32>
      tpu.vector_store %arg10[%c0_29, %c128_30], %49 {strides = array<i32>} : memref<8x256xf32, #tpu.memory_space<vmem>>, vector<8x128xf32>,
      %c0_31 = arith.constant 0 : index
      %c0_32 = arith.constant 0 : index
      %51 = vector.load %arg3[%c0_31, %c0_32] : memref<8x128xf32, #tpu.memory_space<vmem>>, vector<8x128xf32>
      %c0_33 = arith.constant 0 : index
      %c0_34 = arith.constant 0 : index
      %52 = vector.load %arg11[%c0_33, %c0_34] : memref<8x128xf32, #tpu.memory_space<vmem>>, vector<8x128xf32>
      tpu.vector_store %arg11[%c0_33, %c0_34], %51 {strides = array<i32>} : memref<8x128xf32, #tpu.memory_space<vmem>>, vector<8x128xf32>,
    } else {
    }
    %c0 = arith.constant 0 : index
    %c0_1 = arith.constant 0 : index
    %3 = vector.load %arg5[%c0, %c0_1] : memref<1x512xf32, #tpu.memory_space<vmem>>, vector<1x512xf32>
    %4 = vector.shape_cast %3 : vector<1x512xf32> to vector<1x512xf32>
    %5 = vector.broadcast %4 : vector<1x512xf32> to vector<8x512xf32>
    %c0_2 = arith.constant 0 : index
    %c0_3 = arith.constant 0 : index
    %c0_4 = arith.constant 0 : index
    %6 = vector.load %arg1[%c0_2, %c0_3, %c0_4] : memref<1x8x128xf32, #tpu.memory_space<vmem>>, vector<1x8x128xf32>
    %7 = vector.shape_cast %6 : vector<1x8x128xf32> to vector<8x128xf32>
    %c0_5 = arith.constant 0 : index
    %c0_6 = arith.constant 0 : index
    %8 = vector.load %arg10[%c0_5, %c0_6] : memref<8x256xf32, #tpu.memory_space<vmem>>, vector<8x128xf32>
    tpu.vector_store %arg10[%c0_5, %c0_6], %7 {strides = array<i32>} : memref<8x256xf32, #tpu.memory_space<vmem>>, vector<8x128xf32>,
    %c0_7 = arith.constant 0 : index
    %c0_8 = arith.constant 0 : index
    %9 = vector.load %arg10[%c0_7, %c0_8] : memref<8x256xf32, #tpu.memory_space<vmem>>, vector<8x256xf32>
    %c0_9 = arith.constant 0 : index
    %c0_10 = arith.constant 0 : index
    %10 = vector.load %arg4[%c0_9, %c0_10] : memref<256x512xf32, #tpu.memory_space<vmem>>, vector<256x512xf32>
    %cst = arith.constant dense<0.000000e+00> : vector<8x512xf32>
    %11 = tpu.matmul %9, %10, %cst {dimension_numbers = #tpu.dot_dimension_numbers<[1], [0], [0], [1], [0, 0, 1, 1], [], []>} : vector<8x256xf32>, vector<256x512xf32>, vector<8x512xf32> -> vector<8x512xf32>
    %12 = arith.addf %11, %5 : vector<8x512xf32>
    %13 = vector.extract_strided_slice %12 {offsets = [0, 0], sizes = [8, 128], strides = [1, 1]} : vector<8x512xf32> to vector<8x128xf32>
    %14 = arith.negf %13 : vector<8x128xf32>
    %15 = math.exp %14 : vector<8x128xf32>
    %cst_11 = arith.constant 1.000000e+00 : f32
    %16 = vector.broadcast %cst_11 : f32 to vector<8x128xf32>
    %17 = arith.addf %16, %15 : vector<8x128xf32>
    %18 = arith.divf %16, %17 : vector<8x128xf32>
    %19 = vector.extract_strided_slice %12 {offsets = [0, 128], sizes = [8, 128], strides = [1, 1]} : vector<8x512xf32> to vector<8x128xf32>
    %20 = arith.negf %19 : vector<8x128xf32>
    %21 = math.exp %20 : vector<8x128xf32>
    %cst_12 = arith.constant 1.000000e+00 : f32
    %22 = vector.broadcast %cst_12 : f32 to vector<8x128xf32>
    %23 = arith.addf %22, %21 : vector<8x128xf32>
    %24 = arith.divf %22, %23 : vector<8x128xf32>
    %25 = vector.extract_strided_slice %12 {offsets = [0, 256], sizes = [8, 128], strides = [1, 1]} : vector<8x512xf32> to vector<8x128xf32>
    %26 = arith.negf %25 : vector<8x128xf32>
    %27 = math.exp %26 : vector<8x128xf32>
    %cst_13 = arith.constant 1.000000e+00 : f32
    %28 = vector.broadcast %cst_13 : f32 to vector<8x128xf32>
    %29 = arith.addf %28, %27 : vector<8x128xf32>
    %30 = arith.divf %28, %29 : vector<8x128xf32>
    %31 = vector.extract_strided_slice %12 {offsets = [0, 384], sizes = [8, 128], strides = [1, 1]} : vector<8x512xf32> to vector<8x128xf32>
    %32 = math.tanh %31 : vector<8x128xf32>
    %c0_14 = arith.constant 0 : index
    %c0_15 = arith.constant 0 : index
    %33 = vector.load %arg11[%c0_14, %c0_15] : memref<8x128xf32, #tpu.memory_space<vmem>>, vector<8x128xf32>
    %34 = arith.mulf %24, %33 : vector<8x128xf32>
    %35 = arith.mulf %18, %32 : vector<8x128xf32>
    %36 = arith.addf %34, %35 : vector<8x128xf32>
    %37 = math.tanh %36 : vector<8x128xf32>
    %38 = arith.mulf %37, %30 : vector<8x128xf32>
    %c0_16 = arith.constant 0 : index
    %c0_17 = arith.constant 0 : index
    %39 = vector.load %arg6[%c0_16, %c0_17] : memref<128x128xf32, #tpu.memory_space<vmem>>, vector<128x128xf32>
    %cst_18 = arith.constant dense<0.000000e+00> : vector<8x128xf32>
    %40 = tpu.matmul %38, %39, %cst_18 {dimension_numbers = #tpu.dot_dimension_numbers<[1], [0], [0], [1], [0, 0, 1, 1], [], []>} : vector<8x128xf32>, vector<128x128xf32>, vector<8x128xf32> -> vector<8x128xf32>
    %c0_19 = arith.constant 0 : index
    %c0_20 = arith.constant 0 : index
    %c0_21 = arith.constant 0 : index
    %41 = vector.load %arg7[%c0_19, %c0_20, %c0_21] : memref<1x8x128xf32, #tpu.memory_space<vmem>>, vector<1x8x128xf32>
    %42 = vector.shape_cast %41 : vector<1x8x128xf32> to vector<8x128xf32>
    %43 = vector.shape_cast %40 : vector<8x128xf32> to vector<1x8x128xf32>
    tpu.vector_store %arg7[%c0_19, %c0_20, %c0_21], %43 {strides = array<i32>} : memref<1x8x128xf32, #tpu.memory_space<vmem>>, vector<1x8x128xf32>,
    %c0_22 = arith.constant 0 : index
    %c128 = arith.constant 128 : index
    %44 = vector.load %arg10[%c0_22, %c128] : memref<8x256xf32, #tpu.memory_space<vmem>>, vector<8x128xf32>
    tpu.vector_store %arg10[%c0_22, %c128], %38 {strides = array<i32>} : memref<8x256xf32, #tpu.memory_space<vmem>>, vector<8x128xf32>,
    %c0_23 = arith.constant 0 : index
    %c0_24 = arith.constant 0 : index
    %45 = vector.load %arg11[%c0_23, %c0_24] : memref<8x128xf32, #tpu.memory_space<vmem>>, vector<8x128xf32>
    tpu.vector_store %arg11[%c0_23, %c0_24], %36 {strides = array<i32>} : memref<8x128xf32, #tpu.memory_space<vmem>>, vector<8x128xf32>,
    %c0_i32_25 = arith.constant 0 : i32
    %46 = arith.cmpi eq, %arg0, %c0_i32_25 : i32
    %47 = arith.extui %46 : i1 to i32
    %c0_i32_26 = arith.constant 0 : i32
    %48 = arith.cmpi ne, %47, %c0_i32_26 : i32
    scf.if %48 {
      %c0_27 = arith.constant 0 : index
      %c128_28 = arith.constant 128 : index
      %49 = vector.load %arg10[%c0_27, %c128_28] : memref<8x256xf32, #tpu.memory_space<vmem>>, vector<8x128xf32>
      %c0_29 = arith.constant 0 : index
      %c0_30 = arith.constant 0 : index
      %50 = vector.load %arg8[%c0_29, %c0_30] : memref<8x128xf32, #tpu.memory_space<vmem>>, vector<8x128xf32>
      tpu.vector_store %arg8[%c0_29, %c0_30], %49 {strides = array<i32>} : memref<8x128xf32, #tpu.memory_space<vmem>>, vector<8x128xf32>,
      %c0_31 = arith.constant 0 : index
      %c0_32 = arith.constant 0 : index
      %51 = vector.load %arg11[%c0_31, %c0_32] : memref<8x128xf32, #tpu.memory_space<vmem>>, vector<8x128xf32>
      %c0_33 = arith.constant 0 : index
      %c0_34 = arith.constant 0 : index
      %52 = vector.load %arg9[%c0_33, %c0_34] : memref<8x128xf32, #tpu.memory_space<vmem>>, vector<8x128xf32>
      tpu.vector_store %arg9[%c0_33, %c0_34], %51 {strides = array<i32>} : memref<8x128xf32, #tpu.memory_space<vmem>>, vector<8x128xf32>,
    } else {
    }
    return
  }
  func.func @transform_0(%arg0: i32) -> (i32, i32, i32) {
    %c0_i32 = arith.constant 0 : i32
    %c0_i32_0 = arith.constant 0 : i32
    %c0_i32_1 = arith.constant 0 : i32
    return %arg0, %c0_i32, %c0_i32_0 : i32, i32, i32
  }
  func.func @transform_1(%arg0: i32) -> (i32, i32) {
    %c0_i32 = arith.constant 0 : i32
    %c0_i32_0 = arith.constant 0 : i32
    %c0_i32_1 = arith.constant 0 : i32
    return %c0_i32, %c0_i32_0 : i32, i32
  }
  func.func @transform_2(%arg0: i32) -> (i32, i32) {
    %c0_i32 = arith.constant 0 : i32
    %c0_i32_0 = arith.constant 0 : i32
    %c0_i32_1 = arith.constant 0 : i32
    return %c0_i32, %c0_i32_0 : i32, i32
  }
  func.func @transform_3(%arg0: i32) -> (i32, i32) {
    %c0_i32 = arith.constant 0 : i32
    %c0_i32_0 = arith.constant 0 : i32
    %c0_i32_1 = arith.constant 0 : i32
    return %c0_i32, %c0_i32_0 : i32, i32
  }
  func.func @transform_4(%arg0: i32) -> (i32, i32) {
    %c0_i32 = arith.constant 0 : i32
    %c0_i32_0 = arith.constant 0 : i32
    %c0_i32_1 = arith.constant 0 : i32
    return %c0_i32, %c0_i32_0 : i32, i32
  }
  func.func @transform_5(%arg0: i32) -> (i32, i32) {
    %c0_i32 = arith.constant 0 : i32
    %c0_i32_0 = arith.constant 0 : i32
    %c0_i32_1 = arith.constant 0 : i32
    return %c0_i32, %c0_i32_0 : i32, i32
  }
  func.func @transform_6(%arg0: i32) -> (i32, i32, i32) {
    %c0_i32 = arith.constant 0 : i32
    %c0_i32_0 = arith.constant 0 : i32
    %c0_i32_1 = arith.constant 0 : i32
    return %arg0, %c0_i32, %c0_i32_0 : i32, i32, i32
  }
  func.func @transform_7(%arg0: i32) -> (i32, i32) {
    %c0_i32 = arith.constant 0 : i32
    %c0_i32_0 = arith.constant 0 : i32
    %c0_i32_1 = arith.constant 0 : i32
    return %c0_i32, %c0_i32_0 : i32, i32
  }
  func.func @transform_8(%arg0: i32) -> (i32, i32) {
    %c0_i32 = arith.constant 0 : i32
    %c0_i32_0 = arith.constant 0 : i32
    %c0_i32_1 = arith.constant 0 : i32
    return %c0_i32, %c0_i32_0 : i32, i32
  }
}

</mosaic_0001>

<bundles_post_ra>
// kernel: _lstm_sequence_impl.1
= control target key start
LH: loop header
LB: loop body
LE: loop exit
PB: predicated region body
PF: predicated region fallthrough
CT: control target
= control target key end

     0   :  { %vm690_vm0 = vmmov 0   ;;  %s1190_s3 = inlined_call_operand.vmem [shape: f32[256,512], index: 3, kind: input, shape index: {}]   ;;  %s1191_s1 = inlined_call_operand.vmem [shape: f32[8,128], index: 1, kind: input, shape index: {}]   ;;  %s1192_s0 = inlined_call_operand.vmem [shape: f32[1,8,128], index: 0, kind: input, shape index: {}]   ;;  %s1193_s5 = inlined_call_operand.vmem [shape: f32[128,128], index: 5, kind: input, shape index: {}]   ;;  %s1194_s4 = inlined_call_operand.vmem [shape: f32[1,512], index: 4, kind: input, shape index: {}]   ;;  %s1195_s2 = inlined_call_operand.vmem [shape: f32[8,128], index: 2, kind: input, shape index: {}]   ;;  %s1196_s8 = inlined_call_operand.vmem [shape: f32[8,128], index: 8, kind: output, shape index: {2}]   ;;  %s1197_s7 = inlined_call_operand.vmem [shape: f32[8,128], index: 7, kind: output, shape index: {1}]   ;;  %s1198_s6 = inlined_call_operand.vmem [shape: f32[1,8,128], index: 6, kind: output, shape index: {0}]  }
   0x1   :  { %v61_v0 = vld [vmem:[%s1190_s3 + $0x8] sm:$0xff]  ;;  %v60_v2 = vld [vmem:[%s1190_s3] sm:$0xff]  ;;  %v63_v18 = vld [vmem:[%s1190_s3 + $0x18] sm:$0xff] }
   0x2   :  { %v65_v1 = vld [vmem:[%s1190_s3 + $0x28] sm:$0xff]  ;;  %v64_v4 = vld [vmem:[%s1190_s3 + $0x20] sm:$0xff]  ;;  %v67_v19 = vld [vmem:[%s1190_s3 + $0x38] sm:$0xff] }
   0x3   :  { %v518_v3 = vpack.c.bf16 %v65_v1, %v61_v0  ;;  %v69_v5 = vld [vmem:[%s1190_s3 + $0x48] sm:$0xff]  ;;  %v520_v7 = vpack.c.bf16 %v64_v4, %v60_v2  ;;  %v68_v9 = vld [vmem:[%s1190_s3 + $0x40] sm:$0xff]  ;;  %v582_v21 = vpack.c.bf16 %v67_v19, %v63_v18  ;;  %v62_v22 = vld [vmem:[%s1190_s3 + $0x10] sm:$0xff] }
   0x4   :  { %v73_v6 = vld [vmem:[%s1190_s3 + $0x68] sm:$0xff]  ;;  %v72_v10 = vld [vmem:[%s1190_s3 + $0x60] sm:$0xff]  ;;  %v66_v23 = vld [vmem:[%s1190_s3 + $0x30] sm:$0xff] }
   0x5   :  { %v522_v8 = vpack.c.bf16 %v73_v6, %v69_v5  ;;  %v77_v11 = vld [vmem:[%s1190_s3 + $0x88] sm:$0xff]  ;;  %519 = vmatprep.subr.bf16.mxu0 %v518_v3  ;;  %v524_v13 = vpack.c.bf16 %v72_v10, %v68_v9  ;;  %v76_v14 = vld [vmem:[%s1190_s3 + $0x80] sm:$0xff]  ;;  %v584_v24 = vpack.c.bf16 %v66_v23, %v62_v22  ;;  %583 = vmatprep.subr.bf16.mxu1 %v582_v21  ;;  %v71_v26 = vld [vmem:[%s1190_s3 + $0x58] sm:$0xff] }
   0x6   :  { %v81_v12 = vld [vmem:[%s1190_s3 + $0xa8] sm:$0xff]  ;;  %521 = vmatpush1.bf16.msra.mxu0 %v520_v7  ;;  %v80_v15 = vld [vmem:[%s1190_s3 + $0xa0] sm:$0xff]  ;;  %v75_v27 = vld [vmem:[%s1190_s3 + $0x78] sm:$0xff] }
   0x7   :  { %523 = vmatprep.subr.bf16.mxu0 %v522_v8  ;;  %v526_v16 = vpack.c.bf16 %v81_v12, %v77_v11  ;;  %v85_v17 = vld [vmem:[%s1190_s3 + $0xc8] sm:$0xff]  ;;  %v528_v25 = vpack.c.bf16 %v80_v15, %v76_v14  ;;  %v70_v28 = vld [vmem:[%s1190_s3 + $0x50] sm:$0xff]  ;;  %v84_v30 = vld [vmem:[%s1190_s3 + $0xc0] sm:$0xff]  ;;  %585 = vmatpush1.bf16.msra.mxu1 %v584_v24  ;;  %v586_v32 = vpack.c.bf16 %v75_v27, %v71_v26 }
   0x8   :  { %v89_v20 = vld [vmem:[%s1190_s3 + $0xe8] sm:$0xff]  ;;  %v88_v31 = vld [vmem:[%s1190_s3 + $0xe0] sm:$0xff]  ;;  %v74_v33 = vld [vmem:[%s1190_s3 + $0x70] sm:$0xff] }
   0x9   :  { %v530_v29 = vpack.c.bf16 %v89_v20, %v85_v17  ;;  %v93_v34 = vld [vmem:[%s1190_s3 + $0x108] sm:$0xff]  ;;  %v588_v36 = vpack.c.bf16 %v74_v33, %v70_v28  ;;  %v79_v37 = vld [vmem:[%s1190_s3 + $0x98] sm:$0xff]  ;;  %587 = vmatprep.subr.bf16.mxu1 %v586_v32  ;;  %v78_v39 = vld [vmem:[%s1190_s3 + $0x90] sm:$0xff]  ;;  %v532_v41 = vpack.c.bf16 %v88_v31, %v84_v30 }
   0xa   :  { %525 = vmatpush1.bf16.msra.mxu0 %v524_v13  ;;  %v97_v35 = vld [vmem:[%s1190_s3 + $0x128] sm:$0xff]  ;;  %v83_v38 = vld [vmem:[%s1190_s3 + $0xb8] sm:$0xff]  ;;  %v82_v40 = vld [vmem:[%s1190_s3 + $0xb0] sm:$0xff] }
   0xb   :  { %527 = vmatprep.subr.bf16.mxu0 %v526_v16  ;;  %v92_v42 = vld [vmem:[%s1190_s3 + $0x100] sm:$0xff]  ;;  %v590_v44 = vpack.c.bf16 %v83_v38, %v79_v37  ;;  %v534_v45 = vpack.c.bf16 %v97_v35, %v93_v34  ;;  %589 = vmatpush1.bf16.msra.mxu1 %v588_v36  ;;  %v101_v46 = vld [vmem:[%s1190_s3 + $0x148] sm:$0xff]  ;;  %v592_v47 = vpack.c.bf16 %v82_v40, %v78_v39  ;;  %v87_v48 = vld [vmem:[%s1190_s3 + $0xd8] sm:$0xff] }
   0xc   :  { %v96_v43 = vld [vmem:[%s1190_s3 + $0x120] sm:$0xff]  ;;  %v91_v49 = vld [vmem:[%s1190_s3 + $0xf8] sm:$0xff]  ;;  %v105_v50 = vld [vmem:[%s1190_s3 + $0x168] sm:$0xff] }
   0xd   :  { %591 = vmatprep.subr.bf16.mxu1 %v590_v44  ;;  %v594_v51 = vpack.c.bf16 %v91_v49, %v87_v48  ;;  %v86_v52 = vld [vmem:[%s1190_s3 + $0xd0] sm:$0xff]  ;;  %v536_v54 = vpack.c.bf16 %v96_v43, %v92_v42  ;;  %v95_v55 = vld [vmem:[%s1190_s3 + $0x118] sm:$0xff]  ;;  %v538_v57 = vpack.c.bf16 %v105_v50, %v101_v46  ;;  %v100_v58 = vld [vmem:[%s1190_s3 + $0x140] sm:$0xff] }
   0xe   :  { %529 = vmatpush1.bf16.msra.mxu0 %v528_v25  ;;  %v90_v53 = vld [vmem:[%s1190_s3 + $0xf0] sm:$0xff]  ;;  %v99_v56 = vld [vmem:[%s1190_s3 + $0x138] sm:$0xff]  ;;  %v104_v59 = vld [vmem:[%s1190_s3 + $0x160] sm:$0xff] }
   0xf   :  { %531 = vmatprep.subr.bf16.mxu0 %v530_v29  ;;  %593 = vmatpush1.bf16.msra.mxu1 %v592_v47  ;;  %v109_v60 = vld [vmem:[%s1190_s3 + $0x188] sm:$0xff]  ;;  %v596_v61 = vpack.c.bf16 %v90_v53, %v86_v52  ;;  %v598_v63 = vpack.c.bf16 %v99_v56, %v95_v55  ;;  %v94_v0 = vld [vmem:[%s1190_s3 + $0x110] sm:$0xff]  ;;  %v103_v2 = vld [vmem:[%s1190_s3 + $0x158] sm:$0xff]  ;;  %v540_v4 = vpack.c.bf16 %v104_v59, %v100_v58 }
  0x10   :  { %v113_v62 = vld [vmem:[%s1190_s3 + $0x1a8] sm:$0xff]  ;;  %595 = vmatprep.subr.bf16.mxu1 %v594_v51  ;;  %v98_v1 = vld [vmem:[%s1190_s3 + $0x130] sm:$0xff]  ;;  %v107_v3 = vld [vmem:[%s1190_s3 + $0x178] sm:$0xff] }
  0x11   :  { %v542_v5 = vpack.c.bf16 %v113_v62, %v109_v60  ;;  %v108_v6 = vld [vmem:[%s1190_s3 + $0x180] sm:$0xff]  ;;  %v117_v8 = vld [vmem:[%s1190_s3 + $0x1c8] sm:$0xff]  ;;  %v600_v9 = vpack.c.bf16 %v98_v1, %v94_v0  ;;  %v602_v11 = vpack.c.bf16 %v107_v3, %v103_v2  ;;  %v102_v12 = vld [vmem:[%s1190_s3 + $0x150] sm:$0xff] }
  0x12   :  { %533 = vmatpush1.bf16.msra.mxu0 %v532_v41  ;;  %v112_v7 = vld [vmem:[%s1190_s3 + $0x1a0] sm:$0xff]  ;;  %v121_v10 = vld [vmem:[%s1190_s3 + $0x1e8] sm:$0xff]  ;;  %v106_v13 = vld [vmem:[%s1190_s3 + $0x170] sm:$0xff] }
  0x13   :  { %535 = vmatprep.subr.bf16.mxu0 %v534_v45  ;;  %597 = vmatpush1.bf16.msra.mxu1 %v596_v61  ;;  %v111_v14 = vld [vmem:[%s1190_s3 + $0x198] sm:$0xff]  ;;  %v544_v16 = vpack.c.bf16 %v112_v7, %v108_v6  ;;  %v546_v17 = vpack.c.bf16 %v121_v10, %v117_v8  ;;  %v116_v18 = vld [vmem:[%s1190_s3 + $0x1c0] sm:$0xff]  ;;  %v125_v20 = vld [vmem:[%s1190_s3 + $0x208] sm:$0xff]  ;;  %v604_v21 = vpack.c.bf16 %v106_v13, %v102_v12 }
  0x14   :  { %599 = vmatprep.subr.bf16.mxu1 %v598_v63  ;;  %v115_v15 = vld [vmem:[%s1190_s3 + $0x1b8] sm:$0xff]  ;;  %v120_v19 = vld [vmem:[%s1190_s3 + $0x1e0] sm:$0xff]  ;;  %v129_v22 = vld [vmem:[%s1190_s3 + $0x228] sm:$0xff] }
  0x15   :  { %v606_v23 = vpack.c.bf16 %v115_v15, %v111_v14  ;;  %v110_v24 = vld [vmem:[%s1190_s3 + $0x190] sm:$0xff]  ;;  %v119_v26 = vld [vmem:[%s1190_s3 + $0x1d8] sm:$0xff]  ;;  %v548_v28 = vpack.c.bf16 %v120_v19, %v116_v18  ;;  %v550_v29 = vpack.c.bf16 %v129_v22, %v125_v20  ;;  %v124_v30 = vld [vmem:[%s1190_s3 + $0x200] sm:$0xff] }
  0x16   :  { %537 = vmatpush1.bf16.msra.mxu0 %v536_v54  ;;  %v114_v25 = vld [vmem:[%s1190_s3 + $0x1b0] sm:$0xff]  ;;  %v123_v27 = vld [vmem:[%s1190_s3 + $0x1f8] sm:$0xff]  ;;  %v128_v31 = vld [vmem:[%s1190_s3 + $0x220] sm:$0xff] }
  0x17   :  { %539 = vmatprep.subr.bf16.mxu0 %v538_v57  ;;  %601 = vmatpush1.bf16.msra.mxu1 %v600_v9  ;;  %v133_v32 = vld [vmem:[%s1190_s3 + $0x248] sm:$0xff]  ;;  %v608_v33 = vpack.c.bf16 %v114_v25, %v110_v24  ;;  %v610_v35 = vpack.c.bf16 %v123_v27, %v119_v26  ;;  %v118_v36 = vld [vmem:[%s1190_s3 + $0x1d0] sm:$0xff]  ;;  %v127_v38 = vld [vmem:[%s1190_s3 + $0x218] sm:$0xff]  ;;  %v552_v40 = vpack.c.bf16 %v128_v31, %v124_v30 }
  0x18   :  { %603 = vmatprep.subr.bf16.mxu1 %v602_v11  ;;  %v137_v34 = vld [vmem:[%s1190_s3 + $0x268] sm:$0xff]  ;;  %v122_v37 = vld [vmem:[%s1190_s3 + $0x1f0] sm:$0xff]  ;;  %v131_v39 = vld [vmem:[%s1190_s3 + $0x238] sm:$0xff] }
  0x19   :  { %v554_v41 = vpack.c.bf16 %v137_v34, %v133_v32  ;;  %v132_v42 = vld [vmem:[%s1190_s3 + $0x240] sm:$0xff]  ;;  %v141_v44 = vld [vmem:[%s1190_s3 + $0x288] sm:$0xff]  ;;  %v612_v45 = vpack.c.bf16 %v122_v37, %v118_v36  ;;  %v614_v47 = vpack.c.bf16 %v131_v39, %v127_v38  ;;  %v126_v48 = vld [vmem:[%s1190_s3 + $0x210] sm:$0xff] }
  0x1a   :  { %541 = vmatpush1.bf16.msra.mxu0 %v540_v4  ;;  %v136_v43 = vld [vmem:[%s1190_s3 + $0x260] sm:$0xff]  ;;  %v145_v46 = vld [vmem:[%s1190_s3 + $0x2a8] sm:$0xff]  ;;  %v130_v49 = vld [vmem:[%s1190_s3 + $0x230] sm:$0xff] }
  0x1b   :  { %543 = vmatprep.subr.bf16.mxu0 %v542_v5  ;;  %605 = vmatpush1.bf16.msra.mxu1 %v604_v21  ;;  %v135_v50 = vld [vmem:[%s1190_s3 + $0x258] sm:$0xff]  ;;  %v556_v52 = vpack.c.bf16 %v136_v43, %v132_v42  ;;  %v140_v53 = vld [vmem:[%s1190_s3 + $0x280] sm:$0xff]  ;;  %v558_v54 = vpack.c.bf16 %v145_v46, %v141_v44  ;;  %v149_v56 = vld [vmem:[%s1190_s3 + $0x2c8] sm:$0xff]  ;;  %v616_v58 = vpack.c.bf16 %v130_v49, %v126_v48 }
  0x1c   :  { %607 = vmatprep.subr.bf16.mxu1 %v606_v23  ;;  %v139_v51 = vld [vmem:[%s1190_s3 + $0x278] sm:$0xff]  ;;  %v144_v55 = vld [vmem:[%s1190_s3 + $0x2a0] sm:$0xff]  ;;  %v153_v57 = vld [vmem:[%s1190_s3 + $0x2e8] sm:$0xff] }
  0x1d   :  { %v618_v59 = vpack.c.bf16 %v139_v51, %v135_v50  ;;  %v134_v60 = vld [vmem:[%s1190_s3 + $0x250] sm:$0xff]  ;;  %v30_v62 = vld [vmem:[%s1191_s1] sm:$0xff]  ;;  %v143_v63 = vld [vmem:[%s1190_s3 + $0x298] sm:$0xff]  ;;  %v560_v1 = vpack.c.bf16 %v144_v55, %v140_v53  ;;  %v562_v2 = vpack.c.bf16 %v153_v57, %v149_v56 }
  0x1e   :  { %545 = vmatpush1.bf16.msra.mxu0 %v544_v16  ;;  %v138_v61 = vld [vmem:[%s1190_s3 + $0x270] sm:$0xff]  ;;  %v147_v0 = vld [vmem:[%s1190_s3 + $0x2b8] sm:$0xff]  ;;  %252 = vmatprep.mubr.f32.mxu0 %v30_v62  ;;  %v148_v3 = vld [vmem:[%s1190_s3 + $0x2c0] sm:$0xff] }
  0x1f   :  { %547 = vmatprep.subr.bf16.mxu0 %v546_v17  ;;  %609 = vmatpush1.bf16.msra.mxu1 %v608_v33  ;;  %v152_v4 = vld [vmem:[%s1190_s3 + $0x2e0] sm:$0xff]  ;;  %v157_v5 = vld [vmem:[%s1190_s3 + $0x308] sm:$0xff]  ;;  %v620_v6 = vpack.c.bf16 %v138_v61, %v134_v60  ;;  %v622_v8 = vpack.c.bf16 %v147_v0, %v143_v63  ;;  %v142_v9 = vld [vmem:[%s1190_s3 + $0x290] sm:$0xff] }
  0x20   :  { %611 = vmatprep.subr.bf16.mxu1 %v610_v35  ;;  %323 = vmatprep.mubr.f32.mxu1 %v30_v62  ;;  %v161_v7 = vld [vmem:[%s1190_s3 + $0x328] sm:$0xff]  ;;  %v146_v10 = vld [vmem:[%s1190_s3 + $0x2b0] sm:$0xff]  ;;  %v151_v11 = vld [vmem:[%s1190_s3 + $0x2d8] sm:$0xff]  ;;  %v564_v13 = vpack.c.bf16 %v152_v4, %v148_v3 }
  0x21   :  { %v155_v12 = vld [vmem:[%s1190_s3 + $0x2f8] sm:$0xff]  ;;  %v566_v14 = vpack.c.bf16 %v161_v7, %v157_v5  ;;  %v156_v15 = vld [vmem:[%s1190_s3 + $0x300] sm:$0xff]  ;;  %v165_v17 = vld [vmem:[%s1190_s3 + $0x348] sm:$0xff]  ;;  %v624_v18 = vpack.c.bf16 %v146_v10, %v142_v9  ;;  %v689_v5 = vmov 0.0|0.0  }
  0x22   :  { %549 = vmatpush1.bf16.msra.mxu0 %v548_v28  ;;  %v160_v16 = vld [vmem:[%s1190_s3 + $0x320] sm:$0xff]  ;;  %v169_v19 = vld [vmem:[%s1190_s3 + $0x368] sm:$0xff]  ;;  %v626_v20 = vpack.c.bf16 %v155_v12, %v151_v11  ;;  %v150_v21 = vld [vmem:[%s1190_s3 + $0x2d0] sm:$0xff] }
  0x23   :  { %551 = vmatprep.subr.bf16.mxu0 %v550_v29  ;;  %613 = vmatpush1.bf16.msra.mxu1 %v612_v45  ;;  %v154_v22 = vld [vmem:[%s1190_s3 + $0x2f0] sm:$0xff]  ;;  %v159_v23 = vld [vmem:[%s1190_s3 + $0x318] sm:$0xff]  ;;  %v568_v25 = vpack.c.bf16 %v160_v16, %v156_v15  ;;  %v570_v26 = vpack.c.bf16 %v169_v19, %v165_v17  ;;  %v164_v27 = vld [vmem:[%s1190_s3 + $0x340] sm:$0xff] }
  0x24   :  { %615 = vmatprep.subr.bf16.mxu1 %v614_v47  ;;  %v163_v24 = vld [vmem:[%s1190_s3 + $0x338] sm:$0xff]  ;;  %v168_v28 = vld [vmem:[%s1190_s3 + $0x360] sm:$0xff]  ;;  %v173_v29 = vld [vmem:[%s1190_s3 + $0x388] sm:$0xff]  ;;  %v628_v30 = vpack.c.bf16 %v154_v22, %v150_v21 }
  0x25   :  { %v177_v31 = vld [vmem:[%s1190_s3 + $0x3a8] sm:$0xff]  ;;  %v630_v32 = vpack.c.bf16 %v163_v24, %v159_v23  ;;  %v158_v33 = vld [vmem:[%s1190_s3 + $0x310] sm:$0xff]  ;;  %v167_v35 = vld [vmem:[%s1190_s3 + $0x358] sm:$0xff]  ;;  %v572_v37 = vpack.c.bf16 %v168_v28, %v164_v27  ;;  %v691_v23 = vmov 0.0   ;;  %v36_v28 = vlaneseq }
  0x26   :  { %553 = vmatpush1.bf16.msra.mxu0 %v552_v40  ;;  %v162_v34 = vld [vmem:[%s1190_s3 + $0x330] sm:$0xff]  ;;  %v171_v36 = vld [vmem:[%s1190_s3 + $0x378] sm:$0xff]  ;;  %v574_v38 = vpack.c.bf16 %v177_v31, %v173_v29  ;;  %v172_v39 = vld [vmem:[%s1190_s3 + $0x380] sm:$0xff] }
  0x27   :  { %555 = vmatprep.subr.bf16.mxu0 %v554_v41  ;;  %617 = vmatpush1.bf16.msra.mxu1 %v616_v58  ;;  %v176_v40 = vld [vmem:[%s1190_s3 + $0x3a0] sm:$0xff]  ;;  %v181_v41 = vld [vmem:[%s1190_s3 + $0x3c8] sm:$0xff]  ;;  %v632_v42 = vpack.c.bf16 %v162_v34, %v158_v33  ;;  %v634_v44 = vpack.c.bf16 %v171_v36, %v167_v35  ;;  %v166_v45 = vld [vmem:[%s1190_s3 + $0x350] sm:$0xff]  ;;  %v37_v29 = vshrl.u32 %v36_v28, 7 }
  0x28   :  { %619 = vmatprep.subr.bf16.mxu1 %v618_v59  ;;  %v185_v43 = vld [vmem:[%s1190_s3 + $0x3e8] sm:$0xff]  ;;  %v170_v46 = vld [vmem:[%s1190_s3 + $0x370] sm:$0xff]  ;;  %v175_v47 = vld [vmem:[%s1190_s3 + $0x398] sm:$0xff]  ;;  %v576_v49 = vpack.c.bf16 %v176_v40, %v172_v39 }
  0x29   :  { %v179_v48 = vld [vmem:[%s1190_s3 + $0x3b8] sm:$0xff]  ;;  %v578_v50 = vpack.c.bf16 %v185_v43, %v181_v41  ;;  %v180_v51 = vld [vmem:[%s1190_s3 + $0x3c0] sm:$0xff]  ;;  %v636_v53 = vpack.c.bf16 %v170_v46, %v166_v45  ;;  %v174_v55 = vld [vmem:[%s1190_s3 + $0x390] sm:$0xff]  ;;  %v46_v35 = vsub.s32 2, %v37_v29  ;;  %v50_v43 = vsub.s32 3, %v37_v29 }
  0x2a   :  { %557 = vmatpush1.bf16.msra.mxu0 %v556_v52  ;;  %v184_v52 = vld [vmem:[%s1190_s3 + $0x3e0] sm:$0xff]  ;;  %v178_v56 = vld [vmem:[%s1190_s3 + $0x3b0] sm:$0xff]  ;;  %v183_v57 = vld [vmem:[%s1190_s3 + $0x3d8] sm:$0xff] }
  0x2b   :  { %559 = vmatprep.subr.bf16.mxu0 %v558_v54  ;;  %621 = vmatpush1.bf16.msra.mxu1 %v620_v6  ;;  %v638_v54 = vpack.c.bf16 %v179_v48, %v175_v47  ;;  %v187_v58 = vld [vmem:[%s1190_s3 + $0x3f8] sm:$0xff]  ;;  %v580_v59 = vpack.c.bf16 %v184_v52, %v180_v51  ;;  %v640_v60 = vpack.c.bf16 %v178_v56, %v174_v55  ;;  %v182_v62 = vld [vmem:[%s1190_s3 + $0x3d0] sm:$0xff]  ;;  %v56_v0 = vld [vmem:[%s1192_s0] sm:$0xff] }
  0x2c   :  { %623 = vmatprep.subr.bf16.mxu1 %v622_v8  ;;  %v642_v61 = vpack.c.bf16 %v187_v58, %v183_v57  ;;  %v186_v63 = vld [vmem:[%s1190_s3 + $0x3f0] sm:$0xff]  ;;  %v356_v3 = vld [vmem:[%s1193_s5 + $0x8] sm:$0xff]  ;;  %v358_v7 = vld [vmem:[%s1193_s5 + $0x18] sm:$0xff] }
  0x2d   :  { %v357_v6 = vld [vmem:[%s1193_s5 + $0x10] sm:$0xff]  ;;  %v359_v9 = vld [vmem:[%s1193_s5 + $0x20] sm:$0xff]  ;;  %v360_v10 = vld [vmem:[%s1193_s5 + $0x28] sm:$0xff] }
  0x2e   :  { %561 = vmatpush1.bf16.msra.mxu0 %v560_v1  ;;  %v644_v1 = vpack.c.bf16 %v186_v63, %v182_v62  ;;  %v650_v8 = vpack.c.bf16 %v358_v7, %v357_v6  ;;  %v653_v11 = vpack.c.bf16 %v360_v10, %v359_v9  ;;  %v361_v12 = vld [vmem:[%s1193_s5 + $0x30] sm:$0xff]  ;;  %v363_v15 = vld [vmem:[%s1193_s5 + $0x40] sm:$0xff]  ;;  %v364_v16 = vld [vmem:[%s1193_s5 + $0x48] sm:$0xff] }
  0x2f   :  { %563 = vmatprep.subr.bf16.mxu0 %v562_v2  ;;  %625 = vmatpush1.bf16.msra.mxu1 %v624_v18  ;;  %v355_v2 = vld [vmem:[%s1193_s5] sm:$0xff]  ;;  %v659_v17 = vpack.c.bf16 %v364_v16, %v363_v15  ;;  %v365_v18 = vld [vmem:[%s1193_s5 + $0x50] sm:$0xff]  ;;  %v366_v19 = vld [vmem:[%s1193_s5 + $0x58] sm:$0xff] }
  0x30   :  { %627 = vmatprep.subr.bf16.mxu1 %v626_v20  ;;  %v647_v4 = vpack.c.bf16 %v356_v3, %v355_v2  ;;  %v662_v20 = vpack.c.bf16 %v366_v19, %v365_v18  ;;  %v367_v21 = vld [vmem:[%s1193_s5 + $0x60] sm:$0xff]  ;;  %v368_v22 = vld [vmem:[%s1193_s5 + $0x68] sm:$0xff] }
  0x31   :  { %v665_v24 = vpack.c.bf16 %v368_v22, %v367_v21  ;;  %v34_v31 = vld [vmem:[%s1194_s4] sm:$0xf] }
  0x32   :  { %565 = vmatpush1.bf16.msra.mxu0 %v564_v13  ;;  %v362_v13 = vld [vmem:[%s1193_s5 + $0x38] sm:$0xff]  ;;  %v47_v41 = vrot.slane %v34_v31, %v46_v35  ;;  %v51_v47 = vrot.slane %v34_v31, %v50_v43  ;;  %v32_v56 = vld [vmem:[%s1195_s2] sm:$0xff] }
  0x33   :  { %567 = vmatprep.subr.bf16.mxu0 %v566_v14  ;;  %629 = vmatpush1.bf16.msra.mxu1 %v628_v30  ;;  %v656_v14 = vpack.c.bf16 %v362_v13, %v361_v12  ;;  %v38_v30 = vsub.s32 0, %v37_v29 }
  0x34   :  { %631 = vmatprep.subr.bf16.mxu1 %v630_v32  ;;  %v42_v32 = vsub.s32 1, %v37_v29 }
  0x35   :  { %v39_v33 = vrot.slane %v34_v31, %v38_v30 }
  0x36   :  { %569 = vmatpush1.bf16.msra.mxu0 %v568_v25  ;;  %v369_v25 = vld [vmem:[%s1193_s5 + $0x70] sm:$0xff]  ;;  %v43_v34 = vrot.slane %v34_v31, %v42_v32 }
  0x37   :  { %571 = vmatprep.subr.bf16.mxu0 %v570_v26  ;;  %633 = vmatpush1.bf16.msra.mxu1 %v632_v42  ;;  %v370_v26 = vld [vmem:[%s1193_s5 + $0x78] sm:$0xff] }
  0x38   :  { %635 = vmatprep.subr.bf16.mxu1 %v634_v44  ;;  %v668_v27 = vpack.c.bf16 %v370_v26, %v369_v25 }
  0x3a   :  { %573 = vmatpush1.bf16.msra.mxu0 %v572_v37 }
  0x3b   :  { %575 = vmatprep.subr.bf16.mxu0 %v574_v38  ;;  %637 = vmatpush1.bf16.msra.mxu1 %v636_v53 }
  0x3c   :  { %639 = vmatprep.subr.bf16.mxu1 %v638_v54 }
  0x3e   :  { %577 = vmatpush1.bf16.msra.mxu0 %v576_v49 }
  0x3f   :  { %579 = vmatprep.subr.bf16.mxu0 %v578_v50  ;;  %641 = vmatpush1.bf16.msra.mxu1 %v640_v60 }
  0x40   :  { %643 = vmatprep.subr.bf16.mxu1 %v642_v61 }
  0x42   :  { %581 = vmatpush1.bf16.msra.mxu0 %v580_v59 }
  0x43   :  { %645 = vmatpush1.bf16.msra.mxu1 %v644_v1  ;;  %646 = vmatprep.subr.bf16.mxu0 %v689_v5 }
  0x45   :  { %253 = vmatmul.mubr.f32.vlgmr.msra.gmra.mrb[0].mxu0 %v56_v0 }
  0x46   :  { %324 = vmatmul.mubr.f32.vlgmr.msra.gmra.mrb[0].mxu1 %v56_v0  ;;  %648 = vmatpush3.bf16.msra.mxu0 %v647_v4 }
  0x47   :  { %649 = vmatprep.subr.bf16.mxu0 %v689_v5  ;;  %515 = vmatprep.mubr.msk.f32.mxu0 %vm690_vm0, %v691_v23 }
  0x4a   :  { %651 = vmatpush3.bf16.msra.mxu0 %v650_v8 }
  0x4b   :  { %652 = vmatprep.subr.bf16.mxu0 %v689_v5 }
  0x4e   :  { %654 = vmatpush3.bf16.msra.mxu0 %v653_v11 }
  0x4f   :  { %655 = vmatprep.subr.bf16.mxu0 %v689_v5 }
  0x52   :  { %657 = vmatpush3.bf16.msra.mxu0 %v656_v14 }
  0x53   :  { %658 = vmatprep.subr.bf16.mxu0 %v689_v5 }
  0x56   :  { %660 = vmatpush3.bf16.msra.mxu0 %v659_v17 }
  0x57   :  { %661 = vmatprep.subr.bf16.mxu0 %v689_v5 }
  0x5a   :  { %663 = vmatpush3.bf16.msra.mxu0 %v662_v20 }
  0x5b   :  { %664 = vmatprep.subr.bf16.mxu0 %v689_v5 }
  0x5e   :  { %666 = vmatpush3.bf16.msra.mxu0 %v665_v24 }
  0x5f   :  { %667 = vmatprep.subr.bf16.mxu0 %v689_v5 }
  0x62   :  { %669 = vmatpush3.bf16.msra.mxu0 %v668_v27 }
 0x118   :  { %v254_v36 = vpop.f32.mrb[0].mxu0 }
 0x119   :  { %v255_v37 = vadd.f32 %v254_v36, %v39_v33  ;;  %v256_v38 = vpop.f32.mrb[1].mxu0  ;;  %v325_v44 = vpop.f32.mrb[0].mxu1 }
 0x11a   :  { %v257_v39 = vadd.f32 %v256_v38, %v43_v34  ;;  %v327_v45 = vpop.f32.mrb[1].mxu1  ;;  %v326_v46 = vadd.f32 %v325_v44, %v47_v41 }
 0x11b   :  { %v463_v40 = vmul.f32 -1.442695, %v255_v37  ;;  %v328_v49 = vadd.f32 %v327_v45, %v51_v47 }
 0x11c   :  { %v464_v42 = vmul.f32 -1.442695, %v257_v39  ;;  %v465_v48 = vmul.f32 -1.442695, %v326_v46 }
 0x11d   :  { %673 = vpow2.f32 %v463_v40 }
 0x11e   :  { %675 = vpow2.f32 %v464_v42 }
 0x11f   :  { %677 = vpow2.f32 %v465_v48 }
 0x120   :  { %679 = vtanh.f32 %v328_v49 }
 0x127   :  { %v674_v50 = vpop.eup %673 }
 0x128   :  { %v676_v51 = vpop.eup %675  ;;  %v333_v52 = vadd.f32 1.0, %v674_v50 }
 0x129   :  { %v339_v53 = vadd.f32 1.0, %v676_v51  ;;  %v678_v54 = vpop.eup %677 }
 0x12a   :  { %681 = vrcp.f32 %v333_v52  ;;  %v680_v55 = vpop.eup %679  ;;  %v345_v58 = vadd.f32 1.0, %v678_v54 }
 0x12b   :  { %683 = vrcp.f32 %v339_v53 }
 0x12c   :  { %685 = vrcp.f32 %v345_v58 }
 0x134   :  { %v682_v57 = vpop.eup %681 }
 0x135   :  { %v684_v59 = vpop.eup %683  ;;  %v351_v60 = vmul.f32 %v682_v57, %v680_v55 }
 0x136   :  { %v350_v61 = vmul.f32 %v684_v59, %v32_v56  ;;  %v686_v63 = vpop.eup %685 }
 0x138   :  { %v352_v62 = vadd.f32 %v351_v60, %v350_v61 }
 0x13a   :  { %687 = vtanh.f32 %v352_v62  ;;  %450 = vst [vmem:[%s1196_s8] sm:$0xff] %v352_v62 }
 0x144   :  { %v688_v0 = vpop.eup %687 }
 0x145   :  { %v354_v1 = vmul.f32 %v688_v0, %v686_v63 }
 0x147   :  { %516 = vmatmul.mubr.f32.vlgmr.msra.gmra.mrb[2].mxu0 %v354_v1  ;;  %448 = vst [vmem:[%s1197_s7] sm:$0xff] %v354_v1 }
 0x21a   :  { %v437_v2 = vpop.f32.mrb[2].mxu0 }
 0x21b   :  { %441 = vst [vmem:[%s1198_s6] sm:$0xff] %v437_v2  ;;  %v517_v3 = vpop.f32.mrb[3].mxu0 }

</bundles_post_ra>
